<compile_context>
chip_gen: v7x
topology: tpu7x:2x2x1
jax: 0.10.0
libtpu: 0.0.40
codegen_flags: <defaults>
</compile_context>

<pallas_src>
import jax
import jax.numpy as jnp
from jax import lax
from jax.experimental import pallas as pl
from jax.experimental.pallas import tpu as pltpu


def hidden_dense_kernel(x_ref, w_ref, opart_ref, csum_ref):
    # x_ref: [B, tk], w_ref: [tn, tk], opart_ref: [1, 1, B], csum_ref: [1, tk] f32
    ni = pl.program_id(1)   # N-tile index (reduction over neurons, innermost)

    @pl.when(ni == 0)
    def _init():
        csum_ref[...] = jnp.zeros_like(csum_ref)

    # Partial neuron-axis reduction of this W tile (cheap sublane reduce): [1, tk]
    csum_ref[...] += jnp.sum(w_ref[...].astype(jnp.float32), axis=0, keepdims=True)

    @pl.when(ni == pl.num_programs(1) - 1)
    def _finalize():
        # partial[b] = sum_k csum[k] * x[b, k]   -> (1, B); one M=1 MXU push per K tile.
        part = lax.dot_general(
            csum_ref[...], x_ref[...].astype(jnp.float32),
            dimension_numbers=(((1,), (1,)), ((), ())),
            preferred_element_type=jnp.float32)
        opart_ref[...] = part.reshape(opart_ref.shape)


def _pick_tile(dim, pref, unit):
    """Largest divisor of `dim` that is <= pref and a multiple of `unit`.
    Falls back to the full dim (full-extent blocks are always legal)."""
    if dim <= pref:
        return dim
    t = (pref // unit) * unit
    while t >= unit:
        if dim % t == 0:
            return t
        t -= unit
    return dim


def hidden_dense(x, w, *, tn_pref=1024, tk_pref=1024):
    """x: [B, K], w: [N, K]  ->  [B] f32  ==  (x @ w.T).sum(axis=1)."""
    x = x.astype(jnp.float32)
    w = w.astype(jnp.float32)
    B, K = x.shape
    N, K2 = w.shape
    assert K == K2

    tn = _pick_tile(N, tn_pref, 8)      # W sublane (neuron) tile
    tk = _pick_tile(K, tk_pref, 128)    # W/x lane (feature) tile
    # Prefer >= 2 K tiles when K is large enough so the 'parallel' K axis can be
    # sharded across v7x's two TensorCores (halves the W stream per core).
    if K // tk == 1 and K >= 256:
        tk = _pick_tile(K, max(128, (K // 2) // 128 * 128), 128)

    kt, nt = K // tk, N // tn
    grid = (kt, nt)

    # Explicit VMEM budget: double-buffered W + x blocks, output block, colsum scratch.
    vmem_bytes = 2 * tn * tk * 4 + 2 * B * tk * 4 + 2 * B * 4 + tk * 4 + (2 << 20)
    vmem_limit = int(min(max(vmem_bytes, 16 << 20), 48 << 20))

    partials = pl.pallas_call(
        hidden_dense_kernel,
        out_shape=jax.ShapeDtypeStruct((kt, 1, B), jnp.float32),
        grid_spec=pltpu.PrefetchScalarGridSpec(
            num_scalar_prefetch=0,
            grid=grid,
            in_specs=[
                # x tile ignores the N axis -> fetched once per K tile.
                pl.BlockSpec((B, tk), lambda ki, ni: (0, ki)),
                # W tile: streamed exactly once over the whole grid.
                pl.BlockSpec((tn, tk), lambda ki, ni: (ni, ki)),
            ],
            out_specs=pl.BlockSpec((1, 1, B), lambda ki, ni: (ki, 0, 0)),
            scratch_shapes=[pltpu.VMEM((1, tk), jnp.float32)],
        ),
        compiler_params=pltpu.CompilerParams(
            dimension_semantics=("parallel", "arbitrary"),
            vmem_limit_bytes=vmem_limit),
    )(x, w)

    # Tiny (kt, 1, B) partial reduction; per-parallel-tile partials summed in the wrapper.
    return partials.sum(axis=(0, 1))


def reference(x, w):
    return jnp.dot(x, w.T, precision=lax.Precision.HIGHEST).sum(axis=1)


if __name__ == "__main__":
    key = jax.random.PRNGKey(0)

    # --- small test at shapes consistent with the module ---
    batch, input_size, num_neurons = 2, 32, 32
    kx, kw, key = jax.random.split(key, 3)
    bound = 1.0 / (input_size ** 0.5)   # nn.Linear-style U(-1/sqrt(K), 1/sqrt(K)) init
    w = jax.random.uniform(kw, (num_neurons, input_size),
                           minval=-bound, maxval=bound, dtype=jnp.float32)
    x = jax.random.normal(kx, (batch, input_size), dtype=jnp.float32)

    out = hidden_dense(x, w)
    jax.block_until_ready(out)
    ref = reference(x, w)
    assert out.shape == (batch,)
    assert jnp.allclose(out, ref, atol=1e-4, rtol=1e-4), (out, ref)

    # --- larger test exercising the tiled (multi K/N tile) accumulator path ---
    B2, K2, N2 = 4, 1024, 2048
    kx2, kw2 = jax.random.split(key)
    bound2 = 1.0 / (K2 ** 0.5)
    w2 = jax.random.uniform(kw2, (N2, K2), minval=-bound2, maxval=bound2,
                            dtype=jnp.float32)
    x2 = jax.random.normal(kx2, (B2, K2), dtype=jnp.float32)

    out2 = hidden_dense(x2, w2)
    jax.block_until_ready(out2)
    ref2 = reference(x2, w2)
    assert out2.shape == (B2,)
    assert jnp.allclose(out2, ref2, atol=1e-2, rtol=1e-3), (out2, ref2)

    print("KERNEL_OK")
</pallas_src>

<mosaic_0001>
module attributes {stable_mosaic.version = 11 : i64} {
  func.func @hidden_dense_kernel(%arg0: i32, %arg1: i32, %arg2: memref<2x32xf32, #tpu.memory_space<vmem>>, %arg3: memref<32x32xf32, #tpu.memory_space<vmem>>, %arg4: memref<1x1x2xf32, #tpu.memory_space<vmem>>, %arg5: memref<1x32xf32, #tpu.memory_space<vmem>>) attributes {dimension_semantics = [#tpu.dimension_semantics<parallel>, #tpu.dimension_semantics<arbitrary>], iteration_bounds = array<i64: 1, 1>, scalar_prefetch = 0 : i64, scratch_operands = 1 : i64, tpu.core_type = #tpu.core_type<tc>, window_params = [{transform_indices = @transform_0, window_bounds = array<i64: 2, 32>}, {transform_indices = @transform_1, window_bounds = array<i64: 32, 32>}, {transform_indices = @transform_2, window_bounds = array<i64: 1, 1, 2>}]} {
    %c0_i32 = arith.constant 0 : i32
    %0 = arith.cmpi eq, %arg1, %c0_i32 : i32
    %1 = arith.extui %0 : i1 to i32
    %c0_i32_0 = arith.constant 0 : i32
    %2 = arith.cmpi ne, %1, %c0_i32_0 : i32
    scf.if %2 {
      %cst_8 = arith.constant 0.000000e+00 : f32
      %12 = vector.broadcast %cst_8 : f32 to vector<1x32xf32>
      %c0_9 = arith.constant 0 : index
      %c0_10 = arith.constant 0 : index
      %13 = vector.load %arg5[%c0_9, %c0_10] : memref<1x32xf32, #tpu.memory_space<vmem>>, vector<1x32xf32>
      tpu.vector_store %arg5[%c0_9, %c0_10], %12 {strides = array<i32>} : memref<1x32xf32, #tpu.memory_space<vmem>>, vector<1x32xf32>,
    } else {
    }
    %c0 = arith.constant 0 : index
    %c0_1 = arith.constant 0 : index
    %3 = vector.load %arg5[%c0, %c0_1] : memref<1x32xf32, #tpu.memory_space<vmem>>, vector<1x32xf32>
    %c0_2 = arith.constant 0 : index
    %c0_3 = arith.constant 0 : index
    %4 = vector.load %arg3[%c0_2, %c0_3] : memref<32x32xf32, #tpu.memory_space<vmem>>, vector<32x32xf32>
    %cst = arith.constant dense<0.000000e+00> : vector<32xf32>
    %5 = vector.multi_reduction <add>, %4, %cst [0] : vector<32x32xf32> to vector<32xf32>
    %6 = vector.shape_cast %5 : vector<32xf32> to vector<1x32xf32>
    %7 = arith.addf %3, %6 : vector<1x32xf32>
    %c0_4 = arith.constant 0 : index
    %c0_5 = arith.constant 0 : index
    %8 = vector.load %arg5[%c0_4, %c0_5] : memref<1x32xf32, #tpu.memory_space<vmem>>, vector<1x32xf32>
    tpu.vector_store %arg5[%c0_4, %c0_5], %7 {strides = array<i32>} : memref<1x32xf32, #tpu.memory_space<vmem>>, vector<1x32xf32>,
    %c0_i32_6 = arith.constant 0 : i32
    %9 = arith.cmpi eq, %arg1, %c0_i32_6 : i32
    %10 = arith.extui %9 : i1 to i32
    %c0_i32_7 = arith.constant 0 : i32
    %11 = arith.cmpi ne, %10, %c0_i32_7 : i32
    scf.if %11 {
      %c0_8 = arith.constant 0 : index
      %c0_9 = arith.constant 0 : index
      %12 = vector.load %arg5[%c0_8, %c0_9] : memref<1x32xf32, #tpu.memory_space<vmem>>, vector<1x32xf32>
      %c0_10 = arith.constant 0 : index
      %c0_11 = arith.constant 0 : index
      %13 = vector.load %arg2[%c0_10, %c0_11] : memref<2x32xf32, #tpu.memory_space<vmem>>, vector<2x32xf32>
      %cst_12 = arith.constant dense<0.000000e+00> : vector<1x2xf32>
      %14 = tpu.matmul %12, %13, %cst_12 {dimension_numbers = #tpu.dot_dimension_numbers<[1], [1], [0], [0], [0, 0, 1, 0], [], []>} : vector<1x32xf32>, vector<2x32xf32>, vector<1x2xf32> -> vector<1x2xf32>
      %15 = vector.shape_cast %14 : vector<1x2xf32> to vector<1x1x2xf32>
      %c0_13 = arith.constant 0 : index
      %c0_14 = arith.constant 0 : index
      %c0_15 = arith.constant 0 : index
      %16 = vector.load %arg4[%c0_13, %c0_14, %c0_15] : memref<1x1x2xf32, #tpu.memory_space<vmem>>, vector<1x1x2xf32>
      tpu.vector_store %arg4[%c0_13, %c0_14, %c0_15], %15 {strides = array<i32>} : memref<1x1x2xf32, #tpu.memory_space<vmem>>, vector<1x1x2xf32>,
    } else {
    }
    return
  }
  func.func @transform_0(%arg0: i32, %arg1: i32) -> (i32, i32) {
    %c0_i32 = arith.constant 0 : i32
    %c0_i32_0 = arith.constant 0 : i32
    return %c0_i32, %arg0 : i32, i32
  }
  func.func @transform_1(%arg0: i32, %arg1: i32) -> (i32, i32) {
    %c0_i32 = arith.constant 0 : i32
    return %arg1, %arg0 : i32, i32
  }
  func.func @transform_2(%arg0: i32, %arg1: i32) -> (i32, i32, i32) {
    %c0_i32 = arith.constant 0 : i32
    %c0_i32_0 = arith.constant 0 : i32
    %c0_i32_1 = arith.constant 0 : i32
    return %arg0, %c0_i32, %c0_i32_0 : i32, i32, i32
  }
}

</mosaic_0001>

<bundles_post_ra>
// kernel: tpu_custom_call.1
= control target key start
LH: loop header
LB: loop body
LE: loop exit
PB: predicated region body
PF: predicated region fallthrough
CT: control target
= control target key end

     0   :  { %7 = vsyncpa [#allocation4], 0  ;;  %s326_s0 = inlined_call_operand.hbm [shape: f32[2,32], index: 0, kind: input, shape index: {}]   ;;  %s327_s1 = inlined_call_operand.hbm [shape: f32[32,32], index: 1, kind: input, shape index: {}]   ;;  %s328_s2 = inlined_call_operand.hbm [shape: f32[1,1,2], index: 2, kind: output, shape index: {}]  }
   0x1   :  { %8 = vsyncpa [#allocation7], 0 }
   0x2   :  { %9 = vsyncpa [#allocation5], 0  ;;  %s253_s9 = smov [#allocation3]   ;;  %s254_s11 = smov [#allocation6]  }
   0x3   :  { %s16_s10 = sshll.u32 %s253_s9, 4  ;;  %s25_s12 = sshll.u32 %s254_s11, 4  ;;  %s17_s10 = int_to_ptr.vmem [resolvable:$true] %s16_s10  ;;  %s275_s12 = int_to_ptr.vmem [resolvable:$true] %s25_s12 }
   0x4   :  { %s181_s15 = scalar_lea.hbm %s326_s0, 32 }
   0x5   :  { %p182_p0 = scmp.ne.s32.totalorder %s326_s0, %s181_s15  ;;  %p185_p1 = scmp.lt.u32.totalorder %s181_s15, %s326_s0 }
   0x7   :  { %p187_p2 = pnand %p185_p1, %p182_p0 }
   0x9   :  { %190 = shalt.err (!%p187_p2)
}
   0xa   :  { %s191_s20 = scalar_lea.vmem %s17_s10, 32  ;;  %p196_p4 = scmp.lt.s32.totalorder %s17_s10, %s17_s10 }
   0xb   :  { %p192_p3 = scmp.ne.s32.totalorder %s17_s10, %s191_s20  ;;  %p197_p5 = scmp.lt.s32.totalorder %s191_s20, %s191_s20 }
   0xd   :  { %p198_p6 = por %p197_p5, %p196_p4 }
   0xf   :  { %p199_p7 = pnand %p198_p6, %p192_p3 }
  0x11   :  { %202 = shalt.err (!%p199_p7)
}
  0x12   :  { %19 = dma.hbm_to_vmem [thread:$0]  %s326_s0, 32, %s17_s10, [#allocation4]  }
  0x13   :  { %s203_s25 = scalar_lea.hbm %s327_s1, 512 }
  0x14   :  { %p204_p8 = scmp.ne.s32.totalorder %s327_s1, %s203_s25  ;;  %p207_p9 = scmp.lt.u32.totalorder %s203_s25, %s327_s1 }
  0x16   :  { %p209_p10 = pnand %p207_p9, %p204_p8 }
  0x18   :  { %212 = shalt.err (!%p209_p10)
}
  0x19   :  { %s213_s30 = scalar_lea.vmem %s275_s12, 512  ;;  %p218_p12 = scmp.lt.s32.totalorder %s275_s12, %s275_s12 }
  0x1a   :  { %p214_p11 = scmp.ne.s32.totalorder %s275_s12, %s213_s30  ;;  %p219_p13 = scmp.lt.s32.totalorder %s213_s30, %s213_s30 }
  0x1c   :  { %p220_p0 = por %p219_p13, %p218_p12 }
  0x1e   :  { %p221_p1 = pnand %p220_p0, %p214_p11 }
  0x20   :  { %224 = shalt.err (!%p221_p1)
}
  0x21   :  { %s255_s0 = smov 128   ;;  %s256_s3 = smov 8  }
  0x22   :  { %31 = dma.hbm_to_vmem [thread:$0]  %s327_s1, 512, %s275_s12, [#allocation7], %s255_s0, %s255_s0, %s256_s3  }
  0x23   :  { %247 = dma.done.wait [#allocation4], 32  }
  0x24   :  { %248 = vsyncadd [#allocation4], 4294967264 }
  0x25   :  { %249 = dma.done.wait [#allocation7], 512  }
  0x26   :  { %250 = vsyncadd [#allocation7], 4294966784  ;;  %vm42_vm0 = vcmask 253952   ;;  %v257_v0 = vmov 0.0   ;;  %vm258_vm1 = vmmov 0   ;;  %vm49_vm2 = vcmask 261120  }
  0x27   :  { %43 = vst.msk [vmem:[#allocation2] sm:$0x1] %vm42_vm0, %v257_v0  ;;  %169 = vmatprep.subr.mxu0 %v257_v0  ;;  %171 = vmatprep.mubr.msk.f32.mxu0 %vm258_vm1, %v257_v0  ;;  %v45_v1 = vld [vmem:[#allocation6] sm:$0xff]  ;;  %v46_v2 = vld [vmem:[#allocation6 + $0x8] sm:$0xff]  ;;  %v47_v3 = vld [vmem:[#allocation6 + $0x10] sm:$0xff]  ;;  %s259_s1 = smov [#allocation8]  }
  0x28   :  { %v48_v4 = vld [vmem:[#allocation6 + $0x18] sm:$0xff]  ;;  %v50_v5 = vsel %vm49_vm2, %v45_v1, 0.0  ;;  %v51_v6 = vsel %vm49_vm2, %v46_v2, 0.0  ;;  %v53_v7 = vsel %vm49_vm2, %v47_v3, 0.0  ;;  %s155_s6 = sshll.u32 %s259_s1, 4  ;;  %vm147_vm3 = vcmask 8192   ;;  %s156_s6 = int_to_ptr.vmem [resolvable:$true] %s155_s6 }
  0x29   :  { %v52_v8 = vadd.f32 %v51_v6, %v50_v5  ;;  %v70_v9 = vld [vmem:[#allocation3] sm:$0x3]  ;;  %v55_v10 = vsel %vm49_vm2, %v48_v4, 0.0  ;;  %s225_s7 = scalar_lea.vmem %s156_s6, 16  ;;  %s229_s8 = scalar_lea.vmem %s156_s6, 32 }
  0x2a   :  { %170 = vmatpush3.xpose.msk.msra.mxu0 %vm49_vm2, %v70_v9  ;;  %p226_p2 = scmp.ne.s32.totalorder %s156_s6, %s225_s7  ;;  %p230_p3 = scmp.lt.s32.totalorder %s156_s6, %s156_s6 }
  0x2b   :  { %v54_v11 = vadd.f32 %v53_v7, %v52_v8  ;;  %p231_p4 = scmp.lt.s32.totalorder %s229_s8, %s225_s7 }
  0x2d   :  { %v56_v12 = vadd.f32 %v55_v10, %v54_v11  ;;  %p232_p5 = por %p231_p4, %p230_p3 }
  0x2e   :  { %v44_v18 = vld [vmem:[#allocation2] sm:$0x1] }
  0x2f   :  { %v57_v13 = vrot.slane %v56_v12, 4  ;;  %p233_p6 = pnand %p232_p5, %p226_p2 }
  0x31   :  { %v58_v14 = vadd.f32 %v57_v13, %v56_v12 }
  0x33   :  { %v59_v15 = vrot.slane %v58_v14, 2 }
  0x35   :  { %v60_v16 = vadd.f32 %v59_v15, %v58_v14 }
  0x37   :  { %v61_v17 = vrot.slane %v60_v16, 1 }
  0x39   :  { %v62_v19 = vadd.f32 %v61_v17, %v60_v16 }
  0x3b   :  { %v63_v20 = vadd.f32 %v62_v19, %v44_v18 }
  0x3d   :  { %65 = vst.msk [vmem:[#allocation2] sm:$0x1] %vm42_vm0, %v63_v20 }
  0x44   :  { %v69_v21 = vld [vmem:[#allocation2] sm:$0x1] }
  0x45   :  { %172 = vmatmul.mubr.msk.f32.vlgmr.msra.gmra.mrb[0].mxu0 %vm49_vm2, %v69_v21 }
 0x118   :  { %v143_v22 = vpop.f32.mrb[0].mxu0 }
 0x119   :  { %v173_v23 = vpop.f32.mrb[1].mxu0  ;;  %148 = vst.msk [vmem:[#allocation8] sm:$0x1] %vm147_vm3, %v143_v22 }
 0x11a   :  { %236 = shalt.err (!%p233_p6)
}
 0x11b   :  { %s237_s11 = scalar_lea.hbm %s328_s2, 16 }
 0x11c   :  { %p238_p7 = scmp.ne.s32.totalorder %s328_s2, %s237_s11  ;;  %p241_p8 = scmp.lt.u32.totalorder %s237_s11, %s328_s2 }
 0x11e   :  { %p243_p9 = pnand %p241_p8, %p238_p7 }
 0x120   :  { %246 = shalt.err (!%p243_p9)
}
 0x121   :  { %158 = dma.vmem_to_hbm [thread:$0]  %s156_s6, 16, %s328_s2, [#allocation5]  }
 0x122   :  { %251 = dma.done.wait [#allocation5], 16  }
 0x123   :  { %252 = vsyncadd [#allocation5], 4294967280 }
 0x124   :  { %162 = vsyncpa [#allocation4], 1 }
 0x125   :  { %163 = vsyncpa [#allocation7], 1 }
 0x126   :  { %164 = vsyncpa [#allocation5], 1 }

</bundles_post_ra>
